<compile_context>
chip_gen: v7x
topology: tpu7x:2x2x1
jax: 0.10.0
libtpu: 0.0.40
codegen_flags: <defaults>
</compile_context>

<pallas_src>
import jax
import jax.numpy as jnp
from jax.experimental import pallas as pl
from jax.experimental.pallas import tpu as pltpu

_LOG_CLAMP = -100.0                       # matches torch.nn.BCELoss log clamp
_VMEM_BUDGET_PER_BUF = 2 * 1024 * 1024    # bytes per input pipeline buffer


def _round_up(x, m):
    return ((x + m - 1) // m) * m


def _choose_nc_tile(nc_pad):
    for t in (64, 32, 16, 8):
        if nc_pad % t == 0:
            return t
    return nc_pad


def _combined_loss_kernel(pred_ref, tgt_ref, part_ref,
                          inter_acc, psum_acc, tsum_acc, bce_acc):
    k = pl.program_id(1)

    @pl.when(k == 0)
    def _init():
        inter_acc[...] = jnp.zeros_like(inter_acc)
        psum_acc[...] = jnp.zeros_like(psum_acc)
        tsum_acc[...] = jnp.zeros_like(tsum_acc)
        bce_acc[...] = jnp.zeros_like(bce_acc)

    # Upcast in-register (inputs may arrive bf16; v5e has no bf16 VPU/EUP).
    p = pred_ref[...].astype(jnp.float32)
    t = tgt_ref[...].astype(jnp.float32)

    # ---- Dice partials: per-(n, c) spatial sums over this HW tile ----
    inter_part = jnp.sum(p * t, axis=-1, keepdims=True)   # (T_NC, 1)
    psum_part = jnp.sum(p, axis=-1, keepdims=True)
    tsum_part = jnp.sum(t, axis=-1, keepdims=True)

    # ---- BCE partial (clamped logs, matching nn.BCELoss) ----
    log_p = jnp.maximum(jnp.log(p), _LOG_CLAMP)
    log_1mp = jnp.maximum(jnp.log1p(-p), _LOG_CLAMP)
    bce_part = jnp.sum(-(t * log_p + (1.0 - t) * log_1mp),
                       axis=-1, keepdims=True)             # (T_NC, 1)

    # Lane-dense accumulate: (T_NC, 1) broadcast over 128 lanes keeps the
    # per-step stores unmasked (no vst.msk churn); lane 0 is read at finalize.
    inter_acc[...] += inter_part
    psum_acc[...] += psum_part
    tsum_acc[...] += tsum_part
    bce_acc[...] += bce_part

    @pl.when(k == pl.num_programs(1) - 1)
    def _finalize():
        inter = inter_acc[:, 0:1]
        sp = psum_acc[:, 0:1]
        st = tsum_acc[:, 0:1]
        dice = 1.0 - (2.0 * inter + 1.0) / (sp + st + 1.0)  # (T_NC, 1)
        dice_sum = jnp.sum(dice)              # zero-padded rows contribute 0
        bce_sum = jnp.sum(bce_acc[:, 0:1])
        row = jax.lax.broadcasted_iota(jnp.int32, (8, 128), 0)
        part_ref[0, :, :] = jnp.where(
            row == 0, dice_sum, jnp.where(row == 1, bce_sum, 0.0))


def combined_loss(pred, target, *, bce_weight=0.5, dice_weight=0.5):
    """pred, target: (N, C, H, W); pred values in (0, 1). Returns scalar f32."""
    N, C, H, W = pred.shape
    nc, hw = N * C, H * W

    # Flatten to (NC, HW); stream the NATIVE dtype (no host-side f32 upcast,
    # so bf16 inputs halve HBM traffic and are upcast inside the kernel).
    p2 = pred.reshape(nc, hw)
    t2 = target.reshape(nc, hw)

    nc_pad = _round_up(nc, 8)
    t_nc = _choose_nc_tile(nc_pad)

    itemsize = max(jnp.dtype(pred.dtype).itemsize,
                   jnp.dtype(target.dtype).itemsize)
    hw128 = _round_up(hw, 128)
    t_hw = _VMEM_BUDGET_PER_BUF // (t_nc * itemsize)
    t_hw = max(128, (t_hw // 128) * 128)
    t_hw = min(t_hw, hw128)
    hw_pad = _round_up(hw, t_hw)

    # Zero padding contributes 0 to every partial sum (the clamped logs keep
    # p == 0 finite), and the means below divide by the TRUE element counts.
    # For aligned shapes the pads are zero-width (no extra HBM copy).
    if nc_pad != nc or hw_pad != hw:
        p2 = jnp.pad(p2, ((0, nc_pad - nc), (0, hw_pad - hw)))
        t2 = jnp.pad(t2, ((0, nc_pad - nc), (0, hw_pad - hw)))

    n_nc = nc_pad // t_nc
    n_hw = hw_pad // t_hw

    parts = pl.pallas_call(
        _combined_loss_kernel,
        out_shape=jax.ShapeDtypeStruct((n_nc, 8, 128), jnp.float32),
        grid_spec=pltpu.PrefetchScalarGridSpec(
            num_scalar_prefetch=0,
            grid=(n_nc, n_hw),
            in_specs=[
                pl.BlockSpec((t_nc, t_hw), lambda i, k: (i, k)),
                pl.BlockSpec((t_nc, t_hw), lambda i, k: (i, k)),
            ],
            out_specs=pl.BlockSpec((1, 8, 128), lambda i, k: (i, 0, 0)),
            scratch_shapes=[pltpu.VMEM((t_nc, 128), jnp.float32)] * 4,
        ),
        compiler_params=pltpu.CompilerParams(
            dimension_semantics=("parallel", "arbitrary"),
            vmem_limit_bytes=32 * 1024 * 1024,
        ),
    )(p2, t2)

    # Tiny epilogue: O(n_nc) scalars -> means with true counts -> combine.
    dice_mean = parts[:, 0, 0].sum() / nc
    bce_mean = parts[:, 1, 0].sum() / (nc * hw)
    return bce_weight * bce_mean + dice_weight * dice_mean


def _reference_loss(pred, target, bce_weight=0.5, dice_weight=0.5):
    """Pure-JAX reference matching the PyTorch forward exactly."""
    pred = pred.astype(jnp.float32)
    target = target.astype(jnp.float32)
    intersection = (pred * target).sum(axis=2).sum(axis=2)
    dice = 1.0 - (2.0 * intersection + 1.0) / (
        pred.sum(axis=2).sum(axis=2) + target.sum(axis=2).sum(axis=2) + 1.0
    )
    dice = dice.mean()
    log_p = jnp.maximum(jnp.log(pred), _LOG_CLAMP)
    log_1mp = jnp.maximum(jnp.log1p(-pred), _LOG_CLAMP)
    bce = jnp.mean(-(target * log_p + (1.0 - target) * log_1mp))
    return bce_weight * bce + dice_weight * dice


if __name__ == "__main__":
    key = jax.random.PRNGKey(0)
    k1, k2 = jax.random.split(key)

    N, C, H, W = 2, 4, 16, 16
    # pred must be a probability map (BCELoss requires inputs in (0, 1)).
    pred = jax.nn.sigmoid(jax.random.normal(k1, (N, C, H, W), dtype=jnp.float32))
    # target: binary mask, as typical for segmentation.
    target = (jax.random.uniform(k2, (N, C, H, W)) > 0.5).astype(jnp.float32)

    loss = combined_loss(pred, target)
    loss = jax.block_until_ready(loss)

    ref = _reference_loss(pred, target)
    assert jnp.allclose(loss, ref, rtol=1e-5, atol=1e-5), (loss, ref)

    print("KERNEL_OK")
</pallas_src>

<mosaic_0001>
module attributes {stable_mosaic.version = 11 : i64} {
  func.func @_combined_loss_kernel(%arg0: i32, %arg1: i32, %arg2: memref<8x256xf32, #tpu.memory_space<vmem>>, %arg3: memref<8x256xf32, #tpu.memory_space<vmem>>, %arg4: memref<1x8x128xf32, #tpu.memory_space<vmem>>, %arg5: memref<8x128xf32, #tpu.memory_space<vmem>>, %arg6: memref<8x128xf32, #tpu.memory_space<vmem>>, %arg7: memref<8x128xf32, #tpu.memory_space<vmem>>, %arg8: memref<8x128xf32, #tpu.memory_space<vmem>>) attributes {dimension_semantics = [#tpu.dimension_semantics<parallel>, #tpu.dimension_semantics<arbitrary>], iteration_bounds = array<i64: 1, 1>, scalar_prefetch = 0 : i64, scratch_operands = 4 : i64, tpu.core_type = #tpu.core_type<tc>, window_params = [{transform_indices = @transform_0, window_bounds = array<i64: 8, 256>}, {transform_indices = @transform_1, window_bounds = array<i64: 8, 256>}, {transform_indices = @transform_2, window_bounds = array<i64: 1, 8, 128>}]} {
    %c0_i32 = arith.constant 0 : i32
    %0 = arith.cmpi eq, %arg1, %c0_i32 : i32
    %1 = arith.extui %0 : i1 to i32
    %c0_i32_0 = arith.constant 0 : i32
    %2 = arith.cmpi ne, %1, %c0_i32_0 : i32
    scf.if %2 {
      %cst_30 = arith.constant 0.000000e+00 : f32
      %48 = vector.broadcast %cst_30 : f32 to vector<8x128xf32>
      %c0_31 = arith.constant 0 : index
      %c0_32 = arith.constant 0 : index
      %49 = vector.load %arg5[%c0_31, %c0_32] : memref<8x128xf32, #tpu.memory_space<vmem>>, vector<8x128xf32>
      tpu.vector_store %arg5[%c0_31, %c0_32], %48 {strides = array<i32>} : memref<8x128xf32, #tpu.memory_space<vmem>>, vector<8x128xf32>,
      %cst_33 = arith.constant 0.000000e+00 : f32
      %50 = vector.broadcast %cst_33 : f32 to vector<8x128xf32>
      %c0_34 = arith.constant 0 : index
      %c0_35 = arith.constant 0 : index
      %51 = vector.load %arg6[%c0_34, %c0_35] : memref<8x128xf32, #tpu.memory_space<vmem>>, vector<8x128xf32>
      tpu.vector_store %arg6[%c0_34, %c0_35], %50 {strides = array<i32>} : memref<8x128xf32, #tpu.memory_space<vmem>>, vector<8x128xf32>,
      %cst_36 = arith.constant 0.000000e+00 : f32
      %52 = vector.broadcast %cst_36 : f32 to vector<8x128xf32>
      %c0_37 = arith.constant 0 : index
      %c0_38 = arith.constant 0 : index
      %53 = vector.load %arg7[%c0_37, %c0_38] : memref<8x128xf32, #tpu.memory_space<vmem>>, vector<8x128xf32>
      tpu.vector_store %arg7[%c0_37, %c0_38], %52 {strides = array<i32>} : memref<8x128xf32, #tpu.memory_space<vmem>>, vector<8x128xf32>,
      %cst_39 = arith.constant 0.000000e+00 : f32
      %54 = vector.broadcast %cst_39 : f32 to vector<8x128xf32>
      %c0_40 = arith.constant 0 : index
      %c0_41 = arith.constant 0 : index
      %55 = vector.load %arg8[%c0_40, %c0_41] : memref<8x128xf32, #tpu.memory_space<vmem>>, vector<8x128xf32>
      tpu.vector_store %arg8[%c0_40, %c0_41], %54 {strides = array<i32>} : memref<8x128xf32, #tpu.memory_space<vmem>>, vector<8x128xf32>,
    } else {
    }
    %c0 = arith.constant 0 : index
    %c0_1 = arith.constant 0 : index
    %3 = vector.load %arg2[%c0, %c0_1] : memref<8x256xf32, #tpu.memory_space<vmem>>, vector<8x256xf32>
    %c0_2 = arith.constant 0 : index
    %c0_3 = arith.constant 0 : index
    %4 = vector.load %arg3[%c0_2, %c0_3] : memref<8x256xf32, #tpu.memory_space<vmem>>, vector<8x256xf32>
    %5 = arith.mulf %3, %4 : vector<8x256xf32>
    %cst = arith.constant dense<0.000000e+00> : vector<8xf32>
    %6 = vector.multi_reduction <add>, %5, %cst [1] : vector<8x256xf32> to vector<8xf32>
    %7 = vector.shape_cast %6 : vector<8xf32> to vector<8x1xf32>
    %cst_4 = arith.constant dense<0.000000e+00> : vector<8xf32>
    %8 = vector.multi_reduction <add>, %3, %cst_4 [1] : vector<8x256xf32> to vector<8xf32>
    %9 = vector.shape_cast %8 : vector<8xf32> to vector<8x1xf32>
    %cst_5 = arith.constant dense<0.000000e+00> : vector<8xf32>
    %10 = vector.multi_reduction <add>, %4, %cst_5 [1] : vector<8x256xf32> to vector<8xf32>
    %11 = vector.shape_cast %10 : vector<8xf32> to vector<8x1xf32>
    %12 = math.log %3 : vector<8x256xf32>
    %cst_6 = arith.constant -1.000000e+02 : f32
    %13 = vector.broadcast %cst_6 : f32 to vector<8x256xf32>
    %14 = arith.maximumf %12, %13 : vector<8x256xf32>
    %cst_7 = arith.constant 0.000000e+00 : f32
    %15 = vector.broadcast %cst_7 : f32 to vector<8x256xf32>
    %16 = arith.subf %15, %3 : vector<8x256xf32>
    %17 = math.log1p %16 : vector<8x256xf32>
    %cst_8 = arith.constant -1.000000e+02 : f32
    %18 = vector.broadcast %cst_8 : f32 to vector<8x256xf32>
    %19 = arith.maximumf %17, %18 : vector<8x256xf32>
    %20 = arith.mulf %4, %14 : vector<8x256xf32>
    %cst_9 = arith.constant 1.000000e+00 : f32
    %21 = vector.broadcast %cst_9 : f32 to vector<8x256xf32>
    %22 = arith.subf %21, %4 : vector<8x256xf32>
    %23 = arith.mulf %22, %19 : vector<8x256xf32>
    %24 = arith.addf %20, %23 : vector<8x256xf32>
    %cst_10 = arith.constant 0.000000e+00 : f32
    %25 = vector.broadcast %cst_10 : f32 to vector<8x256xf32>
    %26 = arith.subf %25, %24 : vector<8x256xf32>
    %cst_11 = arith.constant dense<0.000000e+00> : vector<8xf32>
    %27 = vector.multi_reduction <add>, %26, %cst_11 [1] : vector<8x256xf32> to vector<8xf32>
    %28 = vector.shape_cast %27 : vector<8xf32> to vector<8x1xf32>
    %c0_12 = arith.constant 0 : index
    %c0_13 = arith.constant 0 : index
    %29 = vector.load %arg5[%c0_12, %c0_13] : memref<8x128xf32, #tpu.memory_space<vmem>>, vector<8x128xf32>
    %30 = vector.broadcast %7 : vector<8x1xf32> to vector<8x128xf32>
    %31 = arith.addf %29, %30 : vector<8x128xf32>
    %c0_14 = arith.constant 0 : index
    %c0_15 = arith.constant 0 : index
    %32 = vector.load %arg5[%c0_14, %c0_15] : memref<8x128xf32, #tpu.memory_space<vmem>>, vector<8x128xf32>
    tpu.vector_store %arg5[%c0_14, %c0_15], %31 {strides = array<i32>} : memref<8x128xf32, #tpu.memory_space<vmem>>, vector<8x128xf32>,
    %c0_16 = arith.constant 0 : index
    %c0_17 = arith.constant 0 : index
    %33 = vector.load %arg6[%c0_16, %c0_17] : memref<8x128xf32, #tpu.memory_space<vmem>>, vector<8x128xf32>
    %34 = vector.broadcast %9 : vector<8x1xf32> to vector<8x128xf32>
    %35 = arith.addf %33, %34 : vector<8x128xf32>
    %c0_18 = arith.constant 0 : index
    %c0_19 = arith.constant 0 : index
    %36 = vector.load %arg6[%c0_18, %c0_19] : memref<8x128xf32, #tpu.memory_space<vmem>>, vector<8x128xf32>
    tpu.vector_store %arg6[%c0_18, %c0_19], %35 {strides = array<i32>} : memref<8x128xf32, #tpu.memory_space<vmem>>, vector<8x128xf32>,
    %c0_20 = arith.constant 0 : index
    %c0_21 = arith.constant 0 : index
    %37 = vector.load %arg7[%c0_20, %c0_21] : memref<8x128xf32, #tpu.memory_space<vmem>>, vector<8x128xf32>
    %38 = vector.broadcast %11 : vector<8x1xf32> to vector<8x128xf32>
    %39 = arith.addf %37, %38 : vector<8x128xf32>
    %c0_22 = arith.constant 0 : index
    %c0_23 = arith.constant 0 : index
    %40 = vector.load %arg7[%c0_22, %c0_23] : memref<8x128xf32, #tpu.memory_space<vmem>>, vector<8x128xf32>
    tpu.vector_store %arg7[%c0_22, %c0_23], %39 {strides = array<i32>} : memref<8x128xf32, #tpu.memory_space<vmem>>, vector<8x128xf32>,
    %c0_24 = arith.constant 0 : index
    %c0_25 = arith.constant 0 : index
    %41 = vector.load %arg8[%c0_24, %c0_25] : memref<8x128xf32, #tpu.memory_space<vmem>>, vector<8x128xf32>
    %42 = vector.broadcast %28 : vector<8x1xf32> to vector<8x128xf32>
    %43 = arith.addf %41, %42 : vector<8x128xf32>
    %c0_26 = arith.constant 0 : index
    %c0_27 = arith.constant 0 : index
    %44 = vector.load %arg8[%c0_26, %c0_27] : memref<8x128xf32, #tpu.memory_space<vmem>>, vector<8x128xf32>
    tpu.vector_store %arg8[%c0_26, %c0_27], %43 {strides = array<i32>} : memref<8x128xf32, #tpu.memory_space<vmem>>, vector<8x128xf32>,
    %c0_i32_28 = arith.constant 0 : i32
    %45 = arith.cmpi eq, %arg1, %c0_i32_28 : i32
    %46 = arith.extui %45 : i1 to i32
    %c0_i32_29 = arith.constant 0 : i32
    %47 = arith.cmpi ne, %46, %c0_i32_29 : i32
    scf.if %47 {
      %c0_30 = arith.constant 0 : index
      %c0_31 = arith.constant 0 : index
      %48 = vector.load %arg5[%c0_30, %c0_31] : memref<8x128xf32, #tpu.memory_space<vmem>>, vector<8x1xf32>
      %c0_32 = arith.constant 0 : index
      %c0_33 = arith.constant 0 : index
      %49 = vector.load %arg6[%c0_32, %c0_33] : memref<8x128xf32, #tpu.memory_space<vmem>>, vector<8x1xf32>
      %c0_34 = arith.constant 0 : index
      %c0_35 = arith.constant 0 : index
      %50 = vector.load %arg7[%c0_34, %c0_35] : memref<8x128xf32, #tpu.memory_space<vmem>>, vector<8x1xf32>
      %cst_36 = arith.constant 2.000000e+00 : f32
      %51 = vector.broadcast %cst_36 : f32 to vector<8x1xf32>
      %52 = arith.mulf %51, %48 : vector<8x1xf32>
      %cst_37 = arith.constant 1.000000e+00 : f32
      %53 = vector.broadcast %cst_37 : f32 to vector<8x1xf32>
      %54 = arith.addf %52, %53 : vector<8x1xf32>
      %55 = arith.addf %49, %50 : vector<8x1xf32>
      %cst_38 = arith.constant 1.000000e+00 : f32
      %56 = vector.broadcast %cst_38 : f32 to vector<8x1xf32>
      %57 = arith.addf %55, %56 : vector<8x1xf32>
      %58 = arith.divf %54, %57 : vector<8x1xf32>
      %cst_39 = arith.constant 1.000000e+00 : f32
      %59 = vector.broadcast %cst_39 : f32 to vector<8x1xf32>
      %60 = arith.subf %59, %58 : vector<8x1xf32>
      %61 = vector.shape_cast %60 : vector<8x1xf32> to vector<1x8x1xf32>
      %cst_40 = arith.constant dense<0.000000e+00> : vector<1xf32>
      %62 = vector.multi_reduction <add>, %61, %cst_40 [1, 2] : vector<1x8x1xf32> to vector<1xf32>
      %63 = vector.shape_cast %62 : vector<1xf32> to vector<1x1x1xf32>
      %64 = vector.extract %63[0, 0, 0] : f32 from vector<1x1x1xf32>
      %c0_41 = arith.constant 0 : index
      %c0_42 = arith.constant 0 : index
      %65 = vector.load %arg8[%c0_41, %c0_42] : memref<8x128xf32, #tpu.memory_space<vmem>>, vector<8x1xf32>
      %66 = vector.shape_cast %65 : vector<8x1xf32> to vector<1x8x1xf32>
      %cst_43 = arith.constant dense<0.000000e+00> : vector<1xf32>
      %67 = vector.multi_reduction <add>, %66, %cst_43 [1, 2] : vector<1x8x1xf32> to vector<1xf32>
      %68 = vector.shape_cast %67 : vector<1xf32> to vector<1x1x1xf32>
      %69 = vector.extract %68[0, 0, 0] : f32 from vector<1x1x1xf32>
      %70 = tpu.iota {dimensions = array<i32: 0>} : vector<8x128xi32>
      %c0_i32_44 = arith.constant 0 : i32
      %71 = vector.broadcast %c0_i32_44 : i32 to vector<8x128xi32>
      %72 = arith.cmpi eq, %70, %71 : vector<8x128xi32>
      %c1_i32 = arith.constant 1 : i32
      %73 = vector.broadcast %c1_i32 : i32 to vector<8x128xi32>
      %74 = arith.cmpi eq, %70, %73 : vector<8x128xi32>
      %cst_45 = arith.constant 0.000000e+00 : f32
      %75 = vector.broadcast %69 : f32 to vector<8x128xf32>
      %76 = vector.broadcast %cst_45 : f32 to vector<8x128xf32>
      %77 = arith.select %74, %75, %76 : vector<8x128xi1>, vector<8x128xf32>
      %78 = vector.broadcast %64 : f32 to vector<8x128xf32>
      %79 = arith.select %72, %78, %77 : vector<8x128xi1>, vector<8x128xf32>
      %c0_46 = arith.constant 0 : index
      %c0_47 = arith.constant 0 : index
      %c0_48 = arith.constant 0 : index
      %80 = vector.load %arg4[%c0_46, %c0_47, %c0_48] : memref<1x8x128xf32, #tpu.memory_space<vmem>>, vector<1x8x128xf32>
      %81 = vector.shape_cast %80 : vector<1x8x128xf32> to vector<8x128xf32>
      %82 = vector.shape_cast %79 : vector<8x128xf32> to vector<1x8x128xf32>
      tpu.vector_store %arg4[%c0_46, %c0_47, %c0_48], %82 {strides = array<i32>} : memref<1x8x128xf32, #tpu.memory_space<vmem>>, vector<1x8x128xf32>,
    } else {
    }
    return
  }
  func.func @transform_0(%arg0: i32, %arg1: i32) -> (i32, i32) {
    %c0_i32 = arith.constant 0 : i32
    return %arg0, %arg1 : i32, i32
  }
  func.func @transform_1(%arg0: i32, %arg1: i32) -> (i32, i32) {
    %c0_i32 = arith.constant 0 : i32
    return %arg0, %arg1 : i32, i32
  }
  func.func @transform_2(%arg0: i32, %arg1: i32) -> (i32, i32, i32) {
    %c0_i32 = arith.constant 0 : i32
    %c0_i32_0 = arith.constant 0 : i32
    %c0_i32_1 = arith.constant 0 : i32
    return %arg0, %c0_i32, %c0_i32_0 : i32, i32, i32
  }
}

</mosaic_0001>

<bundles_post_ra>
// kernel: tpu_custom_call.1
= control target key start
LH: loop header
LB: loop body
LE: loop exit
PB: predicated region body
PF: predicated region fallthrough
CT: control target
= control target key end

     0   :  { %7 = vsyncpa [#allocation7], 0  ;;  %s315_s0 = inlined_call_operand.hbm [shape: f32[8,256], index: 0, kind: input, shape index: {}]   ;;  %s316_s1 = inlined_call_operand.hbm [shape: f32[8,256], index: 1, kind: input, shape index: {}]   ;;  %s317_s2 = inlined_call_operand.hbm [shape: f32[1,8,128], index: 2, kind: output, shape index: {}]  }
   0x1   :  { %8 = vsyncpa [#allocation10], 0 }
   0x2   :  { %9 = vsyncpa [#allocation8], 0  ;;  %s261_s9 = smov [#allocation6]   ;;  %s262_s11 = smov [#allocation9]  }
   0x3   :  { %s16_s10 = sshll.u32 %s261_s9, 4  ;;  %s26_s12 = sshll.u32 %s262_s11, 4  ;;  %s17_s10 = int_to_ptr.vmem [resolvable:$true] %s16_s10  ;;  %s27_s12 = int_to_ptr.vmem [resolvable:$true] %s26_s12 }
   0x4   :  { %s189_s15 = scalar_lea.hbm %s315_s0, 256 }
   0x5   :  { %p190_p0 = scmp.ne.s32.totalorder %s315_s0, %s189_s15  ;;  %p193_p1 = scmp.lt.u32.totalorder %s189_s15, %s315_s0 }
   0x7   :  { %p195_p2 = pnand %p193_p1, %p190_p0 }
   0x9   :  { %198 = shalt.err (!%p195_p2)
}
   0xa   :  { %s199_s20 = scalar_lea.vmem %s17_s10, 256  ;;  %p204_p4 = scmp.lt.s32.totalorder %s17_s10, %s17_s10 }
   0xb   :  { %p200_p3 = scmp.ne.s32.totalorder %s17_s10, %s199_s20  ;;  %p205_p5 = scmp.lt.s32.totalorder %s199_s20, %s199_s20 }
   0xd   :  { %p206_p6 = por %p205_p5, %p204_p4 }
   0xf   :  { %p207_p7 = pnand %p206_p6, %p200_p3 }
  0x11   :  { %210 = shalt.err (!%p207_p7)
}
  0x12   :  { %19 = dma.hbm_to_vmem [thread:$0]  %s315_s0, 256, %s17_s10, [#allocation7]  }
  0x13   :  { %s211_s25 = scalar_lea.hbm %s316_s1, 256 }
  0x14   :  { %p212_p8 = scmp.ne.s32.totalorder %s316_s1, %s211_s25  ;;  %p215_p9 = scmp.lt.u32.totalorder %s211_s25, %s316_s1 }
  0x16   :  { %p217_p10 = pnand %p215_p9, %p212_p8 }
  0x18   :  { %220 = shalt.err (!%p217_p10)
}
  0x19   :  { %s221_s30 = scalar_lea.vmem %s27_s12, 256  ;;  %p226_p12 = scmp.lt.s32.totalorder %s27_s12, %s27_s12 }
  0x1a   :  { %p222_p11 = scmp.ne.s32.totalorder %s27_s12, %s221_s30  ;;  %p227_p13 = scmp.lt.s32.totalorder %s221_s30, %s221_s30 }
  0x1c   :  { %p228_p0 = por %p227_p13, %p226_p12 }
  0x1e   :  { %p229_p1 = pnand %p228_p0, %p222_p11 }
  0x20   :  { %232 = shalt.err (!%p229_p1)
}
  0x21   :  { %29 = dma.hbm_to_vmem [thread:$0]  %s316_s1, 256, %s27_s12, [#allocation10]  }
  0x22   :  { %255 = dma.done.wait [#allocation7], 256  }
  0x23   :  { %256 = vsyncadd [#allocation7], 4294967040 }
  0x24   :  { %257 = dma.done.wait [#allocation10], 256  }
  0x25   :  { %258 = vsyncadd [#allocation10], 4294967040  ;;  %v44_v0 = vld [vmem:[#allocation6] sm:$0xff]  ;;  %v45_v1 = vld [vmem:[#allocation6 + $0x8] sm:$0xff]  ;;  %vm125_vm2 = vcmask 7168   ;;  %s263_s4 = smov [#allocation11]  }
  0x26   :  { %v46_v2 = vld [vmem:[#allocation9] sm:$0xff]  ;;  %v53_v3 = vadd.f32 %v45_v1, %v44_v0  ;;  %179 = vlog2.f32 %v44_v0  ;;  %v65_v4 = vsub.f32 0.0, %v44_v0  ;;  %v66_v5 = vsub.f32 0.0, %v45_v1  ;;  %v47_v6 = vld [vmem:[#allocation9 + $0x8] sm:$0xff]  ;;  %s162_s5 = sshll.u32 %s263_s4, 4  ;;  %s163_s5 = int_to_ptr.vmem [resolvable:$true] %s162_s5 }
  0x27   :  { %181 = vlog2.f32 %v45_v1  ;;  %v48_v7 = vmul.f32 %v46_v2, %v44_v0  ;;  %v49_v8 = vmul.f32 %v47_v6, %v45_v1  ;;  %v56_v9 = vadd.f32 %v47_v6, %v46_v2  ;;  %s233_s7 = scalar_lea.vmem %s163_s5, 128  ;;  %p238_p3 = scmp.lt.s32.totalorder %s163_s5, %s163_s5 }
  0x28   :  { %54 = vadd.xlane.f32.xlu0 %v53_v3  ;;  %v67_v10 = vadd.f32 1.0, %v65_v4  ;;  %v76_v11 = vadd.f32 1.0, %v66_v5  ;;  %v70_v13 = vmul.f32 -0.5, %v65_v4  ;;  %v79_v14 = vmul.f32 -0.5, %v66_v5  ;;  %p234_p2 = scmp.ne.s32.totalorder %s163_s5, %s233_s7  ;;  %p239_p4 = scmp.lt.s32.totalorder %s233_s7, %s233_s7 }
  0x29   :  { %v50_v12 = vadd.f32 %v49_v8, %v48_v7  ;;  %v73_v17 = vand.u32 2147483647, %v65_v4  ;;  %v82_v21 = vand.u32 2147483647, %v66_v5  ;;  %v89_v31 = vsub.f32 1.0, %v46_v2 }
  0x2a   :  { %183 = vlog2.f32 %v67_v10  ;;  %v71_v15 = vadd.f32 1.0, %v70_v13  ;;  %v80_v18 = vadd.f32 1.0, %v79_v14  ;;  %v90_v33 = vsub.f32 1.0, %v47_v6  ;;  %p240_p5 = por %p239_p4, %p238_p3 }
  0x2b   :  { %51 = vadd.xlane.f32.xlu1 %v50_v12  ;;  %185 = vlog2.f32 %v76_v11  ;;  %vm74_vm0 = vcmp.lt.f32.partialorder %v73_v17, 0.0004427343  ;;  %vm83_vm1 = vcmp.lt.f32.partialorder %v82_v21, 0.0004427343 }
  0x2c   :  { %57 = vadd.xlane.f32.xlu0 %v56_v9  ;;  %v72_v23 = vmul.f32 %v71_v15, %v65_v4  ;;  %v81_v26 = vmul.f32 %v80_v18, %v66_v5  ;;  %v147_v9 = vlaneseq  ;;  %p241_p6 = pnand %p240_p5, %p234_p2 }
  0x2e   :  { %v148_v10 = vshrl.u32 %v147_v9, 7 }
  0x30   :  { %v180_v16 = vpop.eup %179  ;;  %vm150_vm3 = vcmp.eq.s32.totalorder %v148_v10, 1  ;;  %vm149_vm4 = vcmp.eq.s32.totalorder %v148_v10, 0 }
  0x31   :  { %v182_v19 = vpop.eup %181  ;;  %v60_v20 = vmul.f32 0.6931472, %v180_v16 }
  0x32   :  { %v62_v22 = vmul.f32 0.6931472, %v182_v19 }
  0x33   :  { %v63_v25 = vmax.f32 %v60_v20, -100.0 }
  0x34   :  { %v184_v24 = vpop.eup %183  ;;  %v64_v28 = vmax.f32 %v62_v22, -100.0 }
  0x35   :  { %v186_v27 = vpop.eup %185  ;;  %v69_v29 = vmul.f32 0.6931472, %v184_v24  ;;  %v87_v36 = vmul.f32 %v63_v25, %v46_v2 }
  0x36   :  { %v78_v30 = vmul.f32 0.6931472, %v186_v27  ;;  %v88_v38 = vmul.f32 %v64_v28, %v47_v6 }
  0x37   :  { %v75_v32 = vsel %vm74_vm0, %v72_v23, %v69_v29 }
  0x38   :  { %v84_v34 = vsel %vm83_vm1, %v81_v26, %v78_v30  ;;  %v85_v35 = vmax.f32 %v75_v32, -100.0 }
  0x39   :  { %v86_v37 = vmax.f32 %v84_v34, -100.0 }
  0x3a   :  { %v91_v39 = vmul.f32 %v89_v31, %v85_v35 }
  0x3b   :  { %v92_v40 = vmul.f32 %v90_v33, %v86_v37 }
  0x3c   :  { %v93_v41 = vadd.f32 %v91_v39, %v87_v36 }
  0x3d   :  { %v94_v42 = vadd.f32 %v92_v40, %v88_v38 }
  0x3e   :  { %v95_v43 = vsub.f32 0.0, %v93_v41 }
  0x3f   :  { %v96_v44 = vsub.f32 0.0, %v94_v42 }
  0x41   :  { %v97_v45 = vadd.f32 %v96_v44, %v95_v43 }
  0x43   :  { %98 = vadd.xlane.f32.xlu1 %v97_v45 }
  0xb5   :  { %v55_v46 = vpop.xlane.xlu0 %54 }
  0xb8   :  { %v52_v50 = vpop.xlane.xlu1 %51 }
  0xb9   :  { %v58_v47 = vpop.xlane.xlu0 %57  ;;  %v118_v51 = vmul.f32 2.0, %v52_v50 }
  0xba   :  { %v120_v48 = vadd.f32 %v58_v47, %v55_v46 }
  0xbb   :  { %v119_v52 = vadd.f32 1.0, %v118_v51 }
  0xbc   :  { %v121_v49 = vadd.f32 1.0, %v120_v48 }
  0xbe   :  { %187 = vrcp.f32 %v121_v49 }
  0xc8   :  { %v188_v53 = vpop.eup %187 }
  0xc9   :  { %v123_v54 = vmul.f32 %v188_v53, %v119_v52 }
  0xcb   :  { %v124_v55 = vsub.f32 1.0, %v123_v54 }
  0xcd   :  { %v126_v56 = vsel %vm125_vm2, %v124_v55, 0.0 }
  0xce   :  { %127 = vadd.xlane.f32.xlu0 %v126_v56 }
  0xd0   :  { %v99_v57 = vpop.xlane.xlu1 %98 }
  0xd1   :  { %v137_v58 = vsel %vm125_vm2, %v99_v57, 0.0 }
  0xd2   :  { %138 = vadd.xlane.f32.xlu1 %v137_v58 }
 0x15b   :  { %v128_v59 = vpop.xlane.xlu0 %127 }
 0x15c   :  { %v129_v60 = vrot.slane %v128_v59, 4 }
 0x15e   :  { %v130_v61 = vadd.f32 %v129_v60, %v128_v59 }
 0x15f   :  { %v139_v62 = vpop.xlane.xlu1 %138 }
 0x160   :  { %v131_v63 = vrot.slane %v130_v61, 2  ;;  %v140_v0 = vrot.slane %v139_v62, 4 }
 0x162   :  { %v141_v1 = vadd.f32 %v140_v0, %v139_v62  ;;  %v132_v2 = vadd.f32 %v131_v63, %v130_v61 }
 0x164   :  { %v142_v3 = vrot.slane %v141_v1, 2  ;;  %v133_v4 = vrot.slane %v132_v2, 1 }
 0x166   :  { %v143_v5 = vadd.f32 %v142_v3, %v141_v1  ;;  %v134_v6 = vadd.f32 %v133_v4, %v132_v2 }
 0x168   :  { %172 = vpush %v134_v6  ;;  %v144_v7 = vrot.slane %v143_v5, 1 }
 0x16a   :  { %v145_v8 = vadd.f32 %v144_v7, %v143_v5 }
 0x16c   :  { %174 = vpush %v145_v8 }
 0x199   :  { %s173_s1 = spop %172 }
 0x19a   :  { %v153_v12 = vstv %s173_s1 }
 0x19d   :  { %s175_s6 = spop %174 }
 0x19e   :  { %v151_v11 = vstv %s175_s6 }
 0x19f   :  { %v152_v13 = vsel %vm150_vm3, %v151_v11, 0.0 }
 0x1a0   :  { %v154_v14 = vsel %vm149_vm4, %v153_v12, %v152_v13 }
 0x1a1   :  { %155 = vst [vmem:[#allocation11] sm:$0xff] %v154_v14 }
 0x1a2   :  { %244 = shalt.err (!%p241_p6)
}
 0x1a3   :  { %s245_s10 = scalar_lea.hbm %s317_s2, 128 }
 0x1a4   :  { %p246_p7 = scmp.ne.s32.totalorder %s317_s2, %s245_s10  ;;  %p249_p8 = scmp.lt.u32.totalorder %s245_s10, %s317_s2 }
 0x1a6   :  { %p251_p9 = pnand %p249_p8, %p246_p7 }
 0x1a8   :  { %254 = shalt.err (!%p251_p9)
}
 0x1a9   :  { %165 = dma.vmem_to_hbm [thread:$0]  %s163_s5, 128, %s317_s2, [#allocation8]  }
 0x1aa   :  { %259 = dma.done.wait [#allocation8], 128  }
 0x1ab   :  { %260 = vsyncadd [#allocation8], 4294967168 }
 0x1ac   :  { %169 = vsyncpa [#allocation7], 1 }
 0x1ad   :  { %170 = vsyncpa [#allocation10], 1 }
 0x1ae   :  { %171 = vsyncpa [#allocation8], 1 }

</bundles_post_ra>
